<compile_context>
chip_gen: v5e
topology: v5e:2x2
jax: 0.10.0
libtpu: 0.0.40
codegen_flags: <defaults>
</compile_context>

<pallas_src>
import jax
import jax.numpy as jnp
from jax.experimental import pallas as pl
from jax.experimental.pallas import tpu as pltpu


def _round_up(x, m):
    return (x + m - 1) // m * m


def _linear_kernel(w_ref, b_ref, x_ref, o_ref):
    # w_ref: SMEM (2,)   -- [w0, w1]
    # b_ref: SMEM (1,)   -- [b0]
    # x_ref: VMEM [2, TILE_B]  (features on sublanes, batch on lanes)
    # o_ref: VMEM [1, TILE_B]  (lane-dense output row)
    w0 = w_ref[0]
    w1 = w_ref[1]
    b0 = b_ref[0]
    # Pure VPU multiply-add; static sublane slices are free ref views.
    o_ref[...] = x_ref[0:1, :] * w0 + x_ref[1:2, :] * w1 + b0


def linear_forward(x, w, b, *, tile_b=None):
    """y = x @ w.T + b for w: [1, 2], b: [1], computed lane-dense on the VPU.

    x: [B, 2] float32 (torch.nn.Linear layout). Returns [B, 1] float32.
    """
    B = x.shape[0]
    if tile_b is None:
        # Batch tile: multiple of 128 lanes. A generous cap keeps grid-step
        # overhead (~0.35 us/step) negligible for large batches while the
        # per-tile VMEM footprint (double-buffered in + out) stays < 1 MiB.
        tile_b = min(8192, _round_up(B, 128))
    b_pad = _round_up(B, tile_b)

    # Layout plumbing in plain JAX: batch -> lane axis, pad to tile multiple.
    x_t = x.T.astype(jnp.float32)                      # [2, B]
    if b_pad != B:
        x_t = jnp.pad(x_t, ((0, 0), (0, b_pad - B)))   # [2, B_pad]

    w_flat = w.reshape(2).astype(jnp.float32)          # SMEM scalars
    b_flat = b.reshape(1).astype(jnp.float32)

    num_tiles = b_pad // tile_b

    y_row = pl.pallas_call(
        _linear_kernel,
        out_shape=jax.ShapeDtypeStruct((1, b_pad), jnp.float32),
        grid=(num_tiles,),
        in_specs=[
            pl.BlockSpec(memory_space=pltpu.MemorySpace.SMEM),   # w (2,)
            pl.BlockSpec(memory_space=pltpu.MemorySpace.SMEM),   # b (1,)
            # Sublane dim = 2 equals the full array extent (allowed); lane
            # dim is a multiple of 128.
            pl.BlockSpec((2, tile_b), lambda i: (0, i)),
        ],
        out_specs=pl.BlockSpec((1, tile_b), lambda i: (0, i)),
        compiler_params=pltpu.CompilerParams(
            dimension_semantics=("parallel",),
        ),
    )(w_flat, b_flat, x_t)

    # Back to torch layout [B, 1] (drop padding lanes).
    return y_row[0, :B].reshape(B, 1)


def init_params(key):
    """Deterministic init matching nn.Linear(2, 1) shapes.

    PyTorch default init: U(-1/sqrt(fan_in), 1/sqrt(fan_in)), fan_in = 2.
    """
    k_w, k_b = jax.random.split(key)
    bound = 1.0 / jnp.sqrt(2.0)
    w = jax.random.uniform(k_w, (1, 2), jnp.float32, -bound, bound)
    b = jax.random.uniform(k_b, (1,), jnp.float32, -bound, bound)
    return w, b


if __name__ == "__main__":
    key = jax.random.PRNGKey(0)
    k_x, k_p = jax.random.split(key)

    # Small batch of inputs, [B, 2] like the PyTorch module expects.
    B = 8
    x = jax.random.normal(k_x, (B, 2), jnp.float32)
    w, b = init_params(k_p)

    y = linear_forward(x, w, b)
    jax.block_until_ready(y)

    # Cross-check against plain JAX reference.
    y_ref = x @ w.T + b
    assert y.shape == (B, 1)
    assert jnp.allclose(y, y_ref, atol=1e-5), "mismatch vs reference"

    print("KERNEL_OK")
</pallas_src>

<mosaic_0001>
module attributes {stable_mosaic.version = 11 : i64} {
  func.func @_linear_kernel(%arg0: i32, %arg1: memref<2xf32, #tpu.memory_space<smem>>, %arg2: memref<1xf32, #tpu.memory_space<smem>>, %arg3: memref<2x128xf32, #tpu.memory_space<vmem>>, %arg4: memref<1x128xf32, #tpu.memory_space<vmem>>) attributes {dimension_semantics = [#tpu.dimension_semantics<parallel>], iteration_bounds = array<i64: 1>, scalar_prefetch = 0 : i64, scratch_operands = 0 : i64, tpu.core_type = #tpu.core_type<tc>, window_params = [{transform_indices = @transform_0, window_bounds = array<i64: 2>}, {transform_indices = @transform_1, window_bounds = array<i64: 1>}, {transform_indices = @transform_2, window_bounds = array<i64: 2, 128>}, {transform_indices = @transform_3, window_bounds = array<i64: 1, 128>}]} {
    %c0 = arith.constant 0 : index
    %0 = memref.load %arg1[%c0] : memref<2xf32, #tpu.memory_space<smem>>
    %c1 = arith.constant 1 : index
    %1 = memref.load %arg1[%c1] : memref<2xf32, #tpu.memory_space<smem>>
    %c0_0 = arith.constant 0 : index
    %2 = memref.load %arg2[%c0_0] : memref<1xf32, #tpu.memory_space<smem>>
    %c0_1 = arith.constant 0 : index
    %c0_2 = arith.constant 0 : index
    %3 = vector.load %arg3[%c0_1, %c0_2] : memref<2x128xf32, #tpu.memory_space<vmem>>, vector<1x128xf32>
    %4 = vector.broadcast %0 : f32 to vector<1x128xf32>
    %5 = arith.mulf %3, %4 : vector<1x128xf32>
    %c1_3 = arith.constant 1 : index
    %c0_4 = arith.constant 0 : index
    %6 = vector.load %arg3[%c1_3, %c0_4] : memref<2x128xf32, #tpu.memory_space<vmem>>, vector<1x128xf32>
    %7 = vector.broadcast %1 : f32 to vector<1x128xf32>
    %8 = arith.mulf %6, %7 : vector<1x128xf32>
    %9 = arith.addf %5, %8 : vector<1x128xf32>
    %10 = vector.broadcast %2 : f32 to vector<1x128xf32>
    %11 = arith.addf %9, %10 : vector<1x128xf32>
    %c0_5 = arith.constant 0 : index
    %c0_6 = arith.constant 0 : index
    %12 = vector.load %arg4[%c0_5, %c0_6] : memref<1x128xf32, #tpu.memory_space<vmem>>, vector<1x128xf32>
    tpu.vector_store %arg4[%c0_5, %c0_6], %11 {strides = array<i32>} : memref<1x128xf32, #tpu.memory_space<vmem>>, vector<1x128xf32>,
    return
  }
  func.func @transform_0(%arg0: i32) -> i32 {
    %c0_i32 = arith.constant 0 : i32
    %c0_i32_0 = arith.constant 0 : i32
    return %c0_i32 : i32
  }
  func.func @transform_1(%arg0: i32) -> i32 {
    %c0_i32 = arith.constant 0 : i32
    %c0_i32_0 = arith.constant 0 : i32
    return %c0_i32 : i32
  }
  func.func @transform_2(%arg0: i32) -> (i32, i32) {
    %c0_i32 = arith.constant 0 : i32
    %c0_i32_0 = arith.constant 0 : i32
    return %c0_i32, %arg0 : i32, i32
  }
  func.func @transform_3(%arg0: i32) -> (i32, i32) {
    %c0_i32 = arith.constant 0 : i32
    %c0_i32_0 = arith.constant 0 : i32
    return %c0_i32, %arg0 : i32, i32
  }
}

</mosaic_0001>

<bundles_post_ra>
// kernel: tpu_custom_call.1
= control target key start
LH: loop header
LB: loop body
LE: loop exit
PB: predicated region body
PF: predicated region fallthrough
CT: control target
= control target key end

     0   :  { %9 = vsyncpa [#allocation5], 0  ;;  %s139_s0 = inlined_call_operand.hbm [shape: f32[2], index: 0, kind: input, shape index: {}]   ;;  %s140_s1 = inlined_call_operand.<no memory space> [shape: f32[1], index: 1, kind: input, shape index: {}]   ;;  %s141_s2 = inlined_call_operand.vmem [shape: f32[2,128], index: 2, kind: input, shape index: {}]   ;;  %s142_s3 = inlined_call_operand.hbm [shape: f32[1,128], index: 3, kind: output, shape index: {}]  }
   0x1   :  { %10 = vsyncpa [#allocation4], 0  ;;  %s16_s14 = sshll.u32 %s139_s0, 4  ;;  %s102_s15 = smov [#allocation3]   ;;  %s17_s14 = int_to_ptr.hbm [resolvable:$true] %s16_s14 }
   0x2   :  { %19 = dma.hbm_to_smem %s17_s14, 16, %s102_s15, [#allocation5]  }
   0x3   :  { %98 = dma.done.wait [#allocation5], 16  }
   0x4   :  { %99 = vsyncadd [#allocation5], 4294967280 }
   0x5   :  { %28 = sfence }
   0x6   :  { %s29_s16 = sld [smem:[#allocation3]]  ;;  %v32_v0 = vld [vmem:[%s141_s2] sm:$0x1]  ;;  %v35_v1 = vld [vmem:[%s141_s2 + $0x1] sm:$0x1]  ;;  %v39_v6 = vstv %s140_s1  ;;  %s103_s23 = smov [#allocation6]  }
   0x7   :  { %s59_s17 = sld [smem:[#allocation3 + $0x1]]  ;;  %s47_s24 = sshll.u32 %s103_s23, 4  ;;  %s48_s24 = int_to_ptr.vmem [resolvable:$true] %s47_s24 }
   0x8   :  { %s49_s27 = sshll.u32 %s142_s3, 4  ;;  %s50_s27 = int_to_ptr.hbm [resolvable:$true] %s49_s27 }
   0xc   :  { %v33_v2 = vstv %s29_s16 }
   0xd   :  { %v34_v3 = vmul.f32 %v33_v2, %v32_v0  ;;  %v36_v4 = vstv %s59_s17 }
   0xe   :  { %v37_v5 = vmul.f32 %v36_v4, %v35_v1 }
  0x10   :  { %v38_v7 = vadd.f32 %v37_v5, %v34_v3 }
  0x12   :  { %v40_v8 = vadd.f32 %v39_v6, %v38_v7 }
  0x14   :  { %41 = vst [vmem:[#allocation6] sm:$0x1] %v40_v8 }
  0x15   :  { %52 = dma.vmem_to_hbm [thread:$0]  %s48_s24, 16, %s50_s27, [#allocation4]  }
  0x16   :  { %100 = dma.done.wait [#allocation4], 16  }
  0x17   :  { %101 = vsyncadd [#allocation4], 4294967280 }
  0x18   :  { %57 = vsyncpa [#allocation4], 1 }
  0x19   :  { %58 = vsyncpa [#allocation5], 1 }

</bundles_post_ra>
